<compile_context>
chip_gen: v5e
topology: v5e:2x2
jax: 0.10.0
libtpu: 0.0.40
codegen_flags: <defaults>
</compile_context>

<pallas_src>
import functools
import math

import jax
import jax.numpy as jnp
from jax.experimental import pallas as pl
from jax.experimental.pallas import tpu as pltpu


# ---------------------------------------------------------------------------
# Tiling constants
# ---------------------------------------------------------------------------
_LANE = 128                        # vreg lane width
_COL_CAP = 2048                    # max lane-axis extent of the 2D slab (elems)
_BLOCK_BYTES = 2 * 1024 * 1024     # ~2 MiB per block per buffer
_SPLIT_BYTES = 1 * 1024 * 1024     # above this, insist on >=2 grid steps (v7x)
_VMEM_LIMIT = 32 * 1024 * 1024     # explicit scoped-VMEM headroom (<= physical
                                   # on v5e/v6e/v7x)


# ---------------------------------------------------------------------------
# Kernel: identity copy of one (TR, COLS) tile (pure HBM->VMEM->HBM traffic).
# ---------------------------------------------------------------------------
def _copy_kernel(x_ref, o_ref):
    o_ref[...] = x_ref[...]


# ---------------------------------------------------------------------------
# Shape / tiling helpers (all trace-time Python on static shapes)
# ---------------------------------------------------------------------------
def _resolve_size(numel, size):
    """PyTorch-style view-shape resolution, including a single -1."""
    size = [int(s) for s in size]
    if size.count(-1) > 1:
        raise ValueError("only one dimension can be inferred (-1)")
    if -1 in size:
        known = 1
        for s in size:
            if s != -1:
                known *= s
        if known == 0 or numel % known != 0:
            raise ValueError(
                f"shape {tuple(size)} is invalid for input of size {numel}")
        size[size.index(-1)] = numel // known
    if math.prod(size) != numel:
        raise ValueError(
            f"shape {tuple(size)} is invalid for input of size {numel}")
    return tuple(size)


def _slab_cols(numel):
    """Lane-axis extent of the canonical 2D slab.

    Both reshapes around the kernel are metadata-only, so the slab shape is
    free: pick the largest multiple-of-128 divisor of numel (capped) for
    full-lane, unmasked stores; fall back to the largest divisor otherwise.
    """
    cap = min(_COL_CAP, numel)
    c = (cap // _LANE) * _LANE
    while c >= _LANE:
        if numel % c == 0:
            return c
        c -= _LANE
    c = cap
    while c > 1:
        if numel % c == 0:
            return c                  # full-extent lane dim -> still legal
        c -= 1
    return 1


def _row_tile(rows, cols, itemsize):
    """Row tile: dtype-aware sublane quantum, ~_BLOCK_BYTES per block, and
    >=2 grid steps for big copies so both v7x TensorCores get work."""
    packing = max(1, 4 // max(itemsize, 1))   # f32:1, bf16:2, int8/fp8:4
    row_q = 8 * packing                       # sublane quantum for this dtype
    if rows <= row_q:
        return rows                           # full extent: always legal
    by_bytes = max(_BLOCK_BYTES // (cols * itemsize), 1)
    tr = min(rows, by_bytes)
    tr = max((tr // row_q) * row_q, row_q)
    if tr >= rows and rows * cols * itemsize >= _SPLIT_BYTES:
        # Single-step grid on a big copy: split rows so the "parallel" axis
        # has >=2 programs (v7x megacore sharding).
        half = -(-rows // 2)
        tr = max(-(-half // row_q) * row_q, row_q)
    return tr


# ---------------------------------------------------------------------------
# Materializing Pallas path
# ---------------------------------------------------------------------------
@functools.partial(jax.jit, static_argnames=("target",))
def _view_copy(x, target):
    numel = x.size
    itemsize = x.dtype.itemsize

    cols = _slab_cols(numel)
    rows = numel // cols
    x2 = x.reshape(rows, cols)                # metadata-only (contiguous input)

    tr = _row_tile(rows, cols, itemsize)
    grid = (pl.cdiv(rows, tr),)

    out2 = pl.pallas_call(
        _copy_kernel,
        out_shape=jax.ShapeDtypeStruct((rows, cols), x.dtype),
        grid=grid,
        in_specs=[pl.BlockSpec((tr, cols), lambda i: (i, 0))],
        out_specs=pl.BlockSpec((tr, cols), lambda i: (i, 0)),
        compiler_params=pltpu.CompilerParams(
            dimension_semantics=("parallel",),
            vmem_limit_bytes=_VMEM_LIMIT),
        cost_estimate=pl.CostEstimate(
            flops=0,
            transcendentals=0,
            bytes_accessed=2 * numel * itemsize),
    )(x2)

    return out2.reshape(target)               # metadata-only


def view(x, size, *, materialize=True):
    """torch.Tensor.view equivalent.

    materialize=False is the recommended production path: `view` is a
    metadata-only op, so a pure reshape (zero kernel launches, zero HBM
    traffic) is the fastest possible implementation on every TPU generation.
    materialize=True routes through the Pallas identity-copy kernel.
    """
    target = _resolve_size(x.size, size)
    if not materialize or x.size == 0:
        return jnp.reshape(x, target)
    return _view_copy(x, target)


class View:
    """JAX/Pallas equivalent of the torchbeast `View` module."""

    # TODO(synk): PyTorch `view` aliases the base tensor (zero-copy); aliasing
    # is not expressible in JAX, so materialize=True produces an identical-
    # valued copy and materialize=False is a metadata-only reshape.
    def __init__(self, *args, materialize=True):
        self.size = tuple(int(a) for a in args)
        self.materialize = materialize

    def __call__(self, x):
        return view(x, self.size, materialize=self.materialize)


if __name__ == "__main__":
    key = jax.random.PRNGKey(0)
    k0, k1 = jax.random.split(key)

    x = jax.random.normal(k0, (2, 4, 16, 16), jnp.float32)

    # Typical torchbeast usage: flatten conv features per batch element.
    view_flat = View(-1, 4 * 16 * 16)                 # -> (2, 1024)
    out = jax.block_until_ready(view_flat(x))
    assert out.shape == (2, 1024)
    assert jnp.array_equal(out, x.reshape(2, 1024))

    # Target last dim < 128: the slab is still lane-dense (independent of it).
    view_3d = View(2, 64, -1)                         # -> (2, 64, 16)
    out3 = jax.block_until_ready(view_3d(x))
    assert out3.shape == (2, 64, 16)
    assert jnp.array_equal(out3, x.reshape(2, 64, 16))

    # bf16: exercises the dtype-aware (16-row) sublane quantum.
    xb = jax.random.normal(k1, (16, 64, 32), jnp.bfloat16)
    outb = jax.block_until_ready(View(-1, 64 * 32)(xb))
    assert outb.shape == (16, 2048)
    assert jnp.array_equal(outb, xb.reshape(16, 2048))

    # Awkward (non-128-divisible) element count: exercises the fallback slab.
    x5 = jnp.arange(2 * 3 * 5, dtype=jnp.float32).reshape(2, 3, 5)
    out5 = jax.block_until_ready(View(3, -1)(x5))
    assert out5.shape == (3, 10)
    assert jnp.array_equal(out5, x5.reshape(3, 10))

    # Production fast path (no kernel launch): metadata-only reshape.
    fast = jax.block_until_ready(View(-1, 1024, materialize=False)(x))
    assert jnp.array_equal(fast, out)

    print("KERNEL_OK")
</pallas_src>

<mosaic_0001>
module attributes {stable_mosaic.version = 11 : i64} {
  func.func @_copy_kernel(%arg0: i32, %arg1: memref<1x2048xf32, #tpu.memory_space<vmem>>, %arg2: memref<1x2048xf32, #tpu.memory_space<vmem>>) attributes {dimension_semantics = [#tpu.dimension_semantics<parallel>], iteration_bounds = array<i64: 1>, scalar_prefetch = 0 : i64, scratch_operands = 0 : i64, tpu.core_type = #tpu.core_type<tc>, window_params = [{transform_indices = @transform_0, window_bounds = array<i64: 1, 2048>}, {transform_indices = @transform_1, window_bounds = array<i64: 1, 2048>}]} {
    %c0 = arith.constant 0 : index
    %c0_0 = arith.constant 0 : index
    %0 = vector.load %arg1[%c0, %c0_0] : memref<1x2048xf32, #tpu.memory_space<vmem>>, vector<1x2048xf32>
    %c0_1 = arith.constant 0 : index
    %c0_2 = arith.constant 0 : index
    %1 = vector.load %arg2[%c0_1, %c0_2] : memref<1x2048xf32, #tpu.memory_space<vmem>>, vector<1x2048xf32>
    tpu.vector_store %arg2[%c0_1, %c0_2], %0 {strides = array<i32>} : memref<1x2048xf32, #tpu.memory_space<vmem>>, vector<1x2048xf32>,
    return
  }
  func.func @transform_0(%arg0: i32) -> (i32, i32) {
    %c0_i32 = arith.constant 0 : i32
    %c0_i32_0 = arith.constant 0 : i32
    return %arg0, %c0_i32 : i32, i32
  }
  func.func @transform_1(%arg0: i32) -> (i32, i32) {
    %c0_i32 = arith.constant 0 : i32
    %c0_i32_0 = arith.constant 0 : i32
    return %arg0, %c0_i32 : i32, i32
  }
}

</mosaic_0001>

<bundles_post_ra>
// kernel: _view_copy.1
= control target key start
LH: loop header
LB: loop body
LE: loop exit
PB: predicated region body
PF: predicated region fallthrough
CT: control target
= control target key end

     0   :  { %s38_s0 = inlined_call_operand.vmem [shape: f32[1,2048], index: 0, kind: input, shape index: {}]   ;;  %s39_s1 = inlined_call_operand.vmem [shape: f32[1,2048], index: 1, kind: output, shape index: {}]  }
   0x1   :  { %v8_v0 = vld [vmem:[%s38_s0] sm:$0xff]  ;;  %v9_v1 = vld [vmem:[%s38_s0 + $0x8] sm:$0xff] }
   0x2   :  { %10 = vst [vmem:[%s39_s1] sm:$0xff] %v8_v0 }
   0x3   :  { %11 = vst [vmem:[%s39_s1 + $0x8] sm:$0xff] %v9_v1 }

</bundles_post_ra>
